<compile_context>
chip_gen: v5e
topology: v5e:2x2
jax: 0.10.0
libtpu: 0.0.40
codegen_flags: <defaults>
</compile_context>

<pallas_src>
import functools

import jax
import jax.numpy as jnp
from jax.experimental import pallas as pl
from jax.experimental.pallas import tpu as pltpu


def _sigmoid(x):
    # sigmoid(x) = 1 / (1 + exp(-x)); approx reciprocal runs on the EUP slot.
    return pl.reciprocal(1.0 + jnp.exp(-x), approx=True)


def _pick_tile(n, target, multiple=1):
    """Largest divisor of n that is a multiple of `multiple` and <= target; else n."""
    best = None
    for d in range(1, n + 1):
        if n % d == 0 and d % multiple == 0 and d <= target:
            best = d
    return best if best is not None else n


_VMEM_LIMIT = 32 * 1024 * 1024  # safe on v5e/v6e/v7x


# ---------------------------------------------------------------------------
# Kernel 1: global average pool (tiled reduction) + 1x1 fc + sigmoid  -> ca
# ---------------------------------------------------------------------------
def _ca_kernel(x_ref, w_ref, b_ref, ca_ref, acc_ref, *, inv_m):
    # x_ref: (1, TM, C)  w_ref: (C, C)  b_ref: (1, C)
    # ca_ref: (1, 1, C)  acc_ref: VMEM (1, C) f32 accumulator
    t = pl.program_id(1)

    @pl.when(t == 0)
    def _():
        acc_ref[...] = jnp.zeros_like(acc_ref)

    acc_ref[...] += jnp.sum(x_ref[0].astype(jnp.float32), axis=0, keepdims=True)

    @pl.when(t == pl.num_programs(1) - 1)
    def _():
        mean = acc_ref[...] * inv_m                       # (1, C)
        c = mean.shape[1]
        # Pad the single row to a full sublane tile before hitting the MXU.
        mean8 = jnp.broadcast_to(mean, (8, c))
        z = jnp.dot(mean8, w_ref[...], preferred_element_type=jnp.float32)
        ca_ref[0] = _sigmoid(z[0:1] + b_ref[...]).astype(ca_ref.dtype)


def channel_attention(x_nhwc, w_fc, b_fc, pool_tile=None):
    B, H, W, C = x_nhwc.shape
    M = H * W
    tm = _pick_tile(M, pool_tile if pool_tile is not None else 1024, 8)
    x2d = x_nhwc.reshape(B, M, C)
    kernel = functools.partial(_ca_kernel, inv_m=1.0 / float(M))
    return pl.pallas_call(
        kernel,
        out_shape=jax.ShapeDtypeStruct((B, 1, C), jnp.float32),
        grid=(B, M // tm),
        in_specs=[
            pl.BlockSpec((1, tm, C), lambda b, t: (b, t, 0)),
            pl.BlockSpec((C, C), lambda b, t: (0, 0)),
            pl.BlockSpec((1, C), lambda b, t: (0, 0)),
        ],
        out_specs=pl.BlockSpec((1, 1, C), lambda b, t: (b, 0, 0)),
        scratch_shapes=[pltpu.VMEM((1, C), jnp.float32)],
        compiler_params=pltpu.CompilerParams(
            dimension_semantics=("parallel", "arbitrary"),
            vmem_limit_bytes=_VMEM_LIMIT),
    )(x2d, w_fc, b_fc)


# ---------------------------------------------------------------------------
# Kernel 2: channel mean / channel max of (x * ca)  -> maps (B, 2, H, W)
# ---------------------------------------------------------------------------
def _maps_kernel(x_ref, ca_ref, maps_ref):
    # x_ref: (1, TH, W, C)   ca_ref: (1, 1, C)   maps_ref: (1, 2, TH, W)
    y = x_ref[0].astype(jnp.float32) * ca_ref[0, 0].astype(jnp.float32)
    maps_ref[0, 0] = jnp.mean(y, axis=-1).astype(maps_ref.dtype)
    maps_ref[0, 1] = jnp.max(y, axis=-1).astype(maps_ref.dtype)


def spatial_maps(x_nhwc, ca, row_tile=None):
    B, H, W, C = x_nhwc.shape
    target = row_tile if row_tile is not None else max(8, (1 << 20) // max(1, W * C * 4))
    th = _pick_tile(H, target, 8)
    return pl.pallas_call(
        _maps_kernel,
        out_shape=jax.ShapeDtypeStruct((B, 2, H, W), jnp.float32),
        grid=(B, H // th),
        in_specs=[
            pl.BlockSpec((1, th, W, C), lambda b, t: (b, t, 0, 0)),
            pl.BlockSpec((1, 1, C), lambda b, t: (b, 0, 0)),
        ],
        out_specs=pl.BlockSpec((1, 2, th, W), lambda b, t: (b, 0, t, 0)),
        compiler_params=pltpu.CompilerParams(
            dimension_semantics=("parallel", "parallel"),
            vmem_limit_bytes=_VMEM_LIMIT),
    )(x_nhwc, ca)


# ---------------------------------------------------------------------------
# Kernel 3: 7x7 conv over padded maps + sigmoid + final x*ca*sa multiply
# ---------------------------------------------------------------------------
def _apply_kernel(x_ref, ca_ref, mp_ref, w_ref, o_ref):
    # x_ref : (1, TH, W, C)     ca_ref: (1, 1, C)
    # mp_ref: (1, 2, H+6, W+6)  (full padded mean/max maps for this batch)
    # w_ref : SMEM (2, 49) conv taps (row 0 = mean channel, row 1 = max channel)
    # o_ref : (1, TH, W, C)
    th = o_ref.shape[1]
    w_out = o_ref.shape[2]
    t = pl.program_id(1)
    r0 = pl.multiple_of(t * th, th)

    # (2, TH+6, W+6) row window of the padded maps for this output row tile.
    win = mp_ref[0, :, pl.ds(r0, th + 6), :]

    acc = jnp.zeros((th, w_out), jnp.float32)
    for j in range(7):                          # hoist the lane-axis (column) shift
        col = win[:, :, j:j + w_out]            # (2, TH+6, W)
        for i in range(7):
            acc = acc + w_ref[0, i * 7 + j] * col[0, i:i + th, :]
            acc = acc + w_ref[1, i * 7 + j] * col[1, i:i + th, :]

    sa = _sigmoid(acc)                          # (TH, W)
    y = x_ref[0].astype(jnp.float32) * ca_ref[0, 0].astype(jnp.float32)
    o_ref[0] = (y * sa[:, :, None]).astype(o_ref.dtype)


def apply_attention(x_nhwc, ca, maps_pad, w_sa, row_tile=None):
    B, H, W, C = x_nhwc.shape
    target = row_tile if row_tile is not None else max(8, (1 << 20) // max(1, W * C * 4))
    th = _pick_tile(H, target, 8)
    return pl.pallas_call(
        _apply_kernel,
        out_shape=jax.ShapeDtypeStruct((B, H, W, C), x_nhwc.dtype),
        grid=(B, H // th),
        in_specs=[
            pl.BlockSpec((1, th, W, C), lambda b, t: (b, t, 0, 0)),
            pl.BlockSpec((1, 1, C), lambda b, t: (b, 0, 0)),
            pl.BlockSpec((1, 2, H + 6, W + 6), lambda b, t: (b, 0, 0, 0)),
            pl.BlockSpec(memory_space=pltpu.MemorySpace.SMEM),
        ],
        out_specs=pl.BlockSpec((1, th, W, C), lambda b, t: (b, t, 0, 0)),
        compiler_params=pltpu.CompilerParams(
            dimension_semantics=("parallel", "parallel"),
            vmem_limit_bytes=_VMEM_LIMIT),
    )(x_nhwc, ca, maps_pad, w_sa)


# ---------------------------------------------------------------------------
# Parameters (deterministic synthetic init) and forward
# ---------------------------------------------------------------------------
def init_cbam_params(key, c1):
    k1, k2, k3 = jax.random.split(key, 3)
    # fc: torch Conv2d(c1, c1, 1, bias=True) weight (c1, c1, 1, 1); stored here
    # transposed as (Cin, Cout) so the kernel computes z = mean @ w_fc + b_fc.
    w_fc = jax.random.normal(k1, (c1, c1), jnp.float32) / jnp.sqrt(float(c1))
    b_fc = 0.1 * jax.random.normal(k2, (c1,), jnp.float32)
    # cv1: torch Conv2d(2, 1, 7, padding=3, bias=False) weight (1, 2, 7, 7);
    # stored as (2, 49) row-major taps (i*7 + j).
    w_sa = (jax.random.normal(k3, (2, 7, 7), jnp.float32) / 7.0).reshape(2, 49)
    return dict(w_fc=w_fc, b_fc=b_fc.reshape(1, c1), w_sa=w_sa)


def cbam_forward(params, x_nchw, *, row_tile=None, pool_tile=None):
    # NCHW (PyTorch) -> NHWC for the kernels.
    x = jnp.transpose(x_nchw, (0, 2, 3, 1))
    ca = channel_attention(x, params["w_fc"], params["b_fc"], pool_tile)   # (B,1,C)
    maps = spatial_maps(x, ca, row_tile)                                   # (B,2,H,W)
    maps_pad = jnp.pad(maps, ((0, 0), (0, 0), (3, 3), (3, 3)))             # tiny tensor
    out = apply_attention(x, ca, maps_pad, params["w_sa"], row_tile)       # (B,H,W,C)
    return jnp.transpose(out, (0, 3, 1, 2))                                # back to NCHW


# ---------------------------------------------------------------------------
# Pure-JAX reference (mirrors the PyTorch CBAM forward)
# ---------------------------------------------------------------------------
def cbam_reference(params, x_nchw):
    xf = x_nchw.astype(jnp.float32)
    pooled = jnp.mean(xf, axis=(2, 3))                          # (B, C)
    z = pooled @ params["w_fc"] + params["b_fc"]                # (B, C)
    ca = jax.nn.sigmoid(z)[:, :, None, None]
    y = xf * ca
    maps = jnp.concatenate(
        [jnp.mean(y, axis=1, keepdims=True), jnp.max(y, axis=1, keepdims=True)],
        axis=1)                                                 # (B, 2, H, W)
    w = params["w_sa"].reshape(2, 7, 7)[None]                   # (1, 2, 7, 7) OIHW
    s = jax.lax.conv_general_dilated(
        maps, w, window_strides=(1, 1), padding=((3, 3), (3, 3)),
        dimension_numbers=("NCHW", "OIHW", "NCHW"))
    sa = jax.nn.sigmoid(s)
    return (y * sa).astype(x_nchw.dtype)


if __name__ == "__main__":
    key = jax.random.PRNGKey(0)
    kx, kp = jax.random.split(key)
    B, C1, H, W = 2, 4, 16, 16
    x = jax.random.normal(kx, (B, C1, H, W), jnp.float32)
    params = init_cbam_params(kp, C1)

    # Small tiles on purpose so the test exercises the multi-tile reduction,
    # the row tiling and the r0>0 halo window path.
    out = cbam_forward(params, x, row_tile=8, pool_tile=64)
    jax.block_until_ready(out)

    ref = cbam_reference(params, x)
    assert out.shape == (B, C1, H, W), out.shape
    assert bool(jnp.all(jnp.isfinite(out)))
    err = float(jnp.max(jnp.abs(out - ref)))
    assert err < 1e-2, err
    print("KERNEL_OK")
</pallas_src>

<mosaic_0001>
module attributes {stable_mosaic.version = 11 : i64} {
  func.func @_ca_kernel(%arg0: i32, %arg1: i32, %arg2: memref<1x64x4xf32, #tpu.memory_space<vmem>>, %arg3: memref<4x4xf32, #tpu.memory_space<vmem>>, %arg4: memref<1x4xf32, #tpu.memory_space<vmem>>, %arg5: memref<1x1x4xf32, #tpu.memory_space<vmem>>, %arg6: memref<1x4xf32, #tpu.memory_space<vmem>>) attributes {dimension_semantics = [#tpu.dimension_semantics<parallel>, #tpu.dimension_semantics<arbitrary>], iteration_bounds = array<i64: 2, 4>, scalar_prefetch = 0 : i64, scratch_operands = 1 : i64, tpu.core_type = #tpu.core_type<tc>, window_params = [{transform_indices = @transform_0, window_bounds = array<i64: 1, 64, 4>}, {pipeline_mode = #tpu.pipeline_mode<synchronous>, transform_indices = @transform_1, window_bounds = array<i64: 4, 4>}, {pipeline_mode = #tpu.pipeline_mode<synchronous>, transform_indices = @transform_2, window_bounds = array<i64: 1, 4>}, {transform_indices = @transform_3, window_bounds = array<i64: 1, 1, 4>}]} {
    %c0_i32 = arith.constant 0 : i32
    %0 = arith.cmpi eq, %arg1, %c0_i32 : i32
    %1 = arith.extui %0 : i1 to i32
    %c0_i32_0 = arith.constant 0 : i32
    %2 = arith.cmpi ne, %1, %c0_i32_0 : i32
    scf.if %2 {
      %cst_8 = arith.constant 0.000000e+00 : f32
      %13 = vector.broadcast %cst_8 : f32 to vector<1x4xf32>
      %c0_9 = arith.constant 0 : index
      %c0_10 = arith.constant 0 : index
      %14 = vector.load %arg6[%c0_9, %c0_10] : memref<1x4xf32, #tpu.memory_space<vmem>>, vector<1x4xf32>
      tpu.vector_store %arg6[%c0_9, %c0_10], %13 {strides = array<i32>} : memref<1x4xf32, #tpu.memory_space<vmem>>, vector<1x4xf32>,
    } else {
    }
    %c0 = arith.constant 0 : index
    %c0_1 = arith.constant 0 : index
    %3 = vector.load %arg6[%c0, %c0_1] : memref<1x4xf32, #tpu.memory_space<vmem>>, vector<1x4xf32>
    %c0_2 = arith.constant 0 : index
    %c0_3 = arith.constant 0 : index
    %c0_4 = arith.constant 0 : index
    %4 = vector.load %arg2[%c0_2, %c0_3, %c0_4] : memref<1x64x4xf32, #tpu.memory_space<vmem>>, vector<1x64x4xf32>
    %5 = vector.shape_cast %4 : vector<1x64x4xf32> to vector<64x4xf32>
    %cst = arith.constant dense<0.000000e+00> : vector<4xf32>
    %6 = vector.multi_reduction <add>, %5, %cst [0] : vector<64x4xf32> to vector<4xf32>
    %7 = vector.shape_cast %6 : vector<4xf32> to vector<1x4xf32>
    %8 = arith.addf %3, %7 : vector<1x4xf32>
    %c0_5 = arith.constant 0 : index
    %c0_6 = arith.constant 0 : index
    %9 = vector.load %arg6[%c0_5, %c0_6] : memref<1x4xf32, #tpu.memory_space<vmem>>, vector<1x4xf32>
    tpu.vector_store %arg6[%c0_5, %c0_6], %8 {strides = array<i32>} : memref<1x4xf32, #tpu.memory_space<vmem>>, vector<1x4xf32>,
    %c3_i32 = arith.constant 3 : i32
    %10 = arith.cmpi eq, %arg1, %c3_i32 : i32
    %11 = arith.extui %10 : i1 to i32
    %c0_i32_7 = arith.constant 0 : i32
    %12 = arith.cmpi ne, %11, %c0_i32_7 : i32
    scf.if %12 {
      %c0_8 = arith.constant 0 : index
      %c0_9 = arith.constant 0 : index
      %13 = vector.load %arg6[%c0_8, %c0_9] : memref<1x4xf32, #tpu.memory_space<vmem>>, vector<1x4xf32>
      %cst_10 = arith.constant 3.906250e-03 : f32
      %14 = vector.broadcast %cst_10 : f32 to vector<1x4xf32>
      %15 = arith.mulf %13, %14 : vector<1x4xf32>
      %16 = vector.shape_cast %15 : vector<1x4xf32> to vector<1x4xf32>
      %17 = vector.broadcast %16 : vector<1x4xf32> to vector<8x4xf32>
      %c0_11 = arith.constant 0 : index
      %c0_12 = arith.constant 0 : index
      %18 = vector.load %arg3[%c0_11, %c0_12] : memref<4x4xf32, #tpu.memory_space<vmem>>, vector<4x4xf32>
      %cst_13 = arith.constant dense<0.000000e+00> : vector<8x4xf32>
      %19 = tpu.matmul %17, %18, %cst_13 {dimension_numbers = #tpu.dot_dimension_numbers<[1], [0], [0], [1], [0, 0, 1, 1], [], []>} : vector<8x4xf32>, vector<4x4xf32>, vector<8x4xf32> -> vector<8x4xf32>
      %20 = vector.extract_strided_slice %19 {offsets = [0, 0], sizes = [1, 4], strides = [1, 1]} : vector<8x4xf32> to vector<1x4xf32>
      %c0_14 = arith.constant 0 : index
      %c0_15 = arith.constant 0 : index
      %21 = vector.load %arg4[%c0_14, %c0_15] : memref<1x4xf32, #tpu.memory_space<vmem>>, vector<1x4xf32>
      %22 = arith.addf %20, %21 : vector<1x4xf32>
      %cst_16 = arith.constant 0.000000e+00 : f32
      %23 = vector.broadcast %cst_16 : f32 to vector<1x4xf32>
      %24 = arith.subf %23, %22 : vector<1x4xf32>
      %25 = math.exp %24 : vector<1x4xf32>
      %cst_17 = arith.constant 1.000000e+00 : f32
      %26 = vector.broadcast %cst_17 : f32 to vector<1x4xf32>
      %27 = arith.addf %26, %25 : vector<1x4xf32>
      %28 = tpu.reciprocal %27 {approx = true} : vector<1x4xf32> -> vector<1x4xf32>
      %c0_18 = arith.constant 0 : index
      %c0_19 = arith.constant 0 : index
      %c0_20 = arith.constant 0 : index
      %29 = vector.load %arg5[%c0_18, %c0_19, %c0_20] : memref<1x1x4xf32, #tpu.memory_space<vmem>>, vector<1x1x4xf32>
      %30 = vector.shape_cast %29 : vector<1x1x4xf32> to vector<1x4xf32>
      %31 = vector.shape_cast %28 : vector<1x4xf32> to vector<1x1x4xf32>
      tpu.vector_store %arg5[%c0_18, %c0_19, %c0_20], %31 {strides = array<i32>} : memref<1x1x4xf32, #tpu.memory_space<vmem>>, vector<1x1x4xf32>,
    } else {
    }
    return
  }
  func.func @transform_0(%arg0: i32, %arg1: i32) -> (i32, i32, i32) {
    %c0_i32 = arith.constant 0 : i32
    %c0_i32_0 = arith.constant 0 : i32
    return %arg0, %arg1, %c0_i32 : i32, i32, i32
  }
  func.func @transform_1(%arg0: i32, %arg1: i32) -> (i32, i32) {
    %c0_i32 = arith.constant 0 : i32
    %c0_i32_0 = arith.constant 0 : i32
    %c0_i32_1 = arith.constant 0 : i32
    return %c0_i32, %c0_i32_0 : i32, i32
  }
  func.func @transform_2(%arg0: i32, %arg1: i32) -> (i32, i32) {
    %c0_i32 = arith.constant 0 : i32
    %c0_i32_0 = arith.constant 0 : i32
    %c0_i32_1 = arith.constant 0 : i32
    return %c0_i32, %c0_i32_0 : i32, i32
  }
  func.func @transform_3(%arg0: i32, %arg1: i32) -> (i32, i32, i32) {
    %c0_i32 = arith.constant 0 : i32
    %c0_i32_0 = arith.constant 0 : i32
    %c0_i32_1 = arith.constant 0 : i32
    return %arg0, %c0_i32, %c0_i32_0 : i32, i32, i32
  }
}

</mosaic_0001>

<bundles_post_ra>
// kernel: tpu_custom_call.1
= control target key start
LH: loop header
LB: loop body
LE: loop exit
PB: predicated region body
PF: predicated region fallthrough
CT: control target
= control target key end

     0   :  { %8 = vsyncpa [#allocation4], 0  ;;  %s716_s0 = inlined_call_operand.vmem [shape: f32[2,256,4], index: 0, kind: input, shape index: {}]   ;;  %s717_s1 = inlined_call_operand.vmem [shape: f32[4,4], index: 1, kind: input, shape index: {}]   ;;  %s718_s2 = inlined_call_operand.vmem [shape: f32[1,4], index: 2, kind: input, shape index: {}]   ;;  %s719_s3 = inlined_call_operand.hbm [shape: f32[2,1,4], index: 3, kind: output, shape index: {}]  }
   0x1   :  { %10 = vsyncpa [#allocation4 + $0x1], 0  ;;  %s571_s12 = smov 0   ;;  %s573_s13 = smov 0  }
   0x2   :  { %s575_s14 = smov 0   ;;  %s577_s15 = smov 0  }
   0x3   :  { %s579_s16 = smov 0   ;;  %s581_s17 = smov 0  }
   0x4   :  { %s583_s18 = smov 0   ;;  %s585_s19 = smov 0  }
   0x5 LB: > { %s364_s20 = sadd.s32 4294967295, %s548_s19   ;;  %s365_s21 = sadd.s32 4294967294, %s548_s19   ;;  %s548_s19 = sphi %s585_s19, %s16_s19   ;;  %s544_s18 = sphi %s583_s18, %s728_s18   ;;  %s540_s17 = sphi %s581_s17, %s727_s17   ;;  %s536_s16 = sphi %s579_s16, %s726_s16   ;;  %s532_s15 = sphi %s577_s15, %s725_s15   ;;  %s528_s14 = sphi %s575_s14, %s724_s14   ;;  %s524_s13 = sphi %s573_s13, %s723_s13   ;;  %s520_s12 = sphi %s571_s12, %s722_s12  }
   0x6   : > { %s25_s22 = sadd.s32 1, %s540_s17  ;;  %s28_s23 = sadd.s32 1, %s544_s18 }
   0x7   : > { %p26_p0 = scmp.ge.s32.totalorder %s25_s22, 4  ;;  %p115_p1 = scmp.ne.s32.totalorder %s528_s14, %s524_s13 }
   0x8   : > { %p116_p2 = scmp.eq.s32.totalorder %s364_s20, 7  ;;  %p121_p4 = scmp.ne.s32.totalorder %s524_s13, %s520_s12 }
   0x9   : > { %s730_s22 = smov (%p26_p0, %s25_s22), 0  ;;  %s732_s23 = smov (!%p26_p0, %s28_s23), %s544_s18 }
   0xa   : > { %p620_p3 = por %p116_p2, %p115_p1  ;;  %p30_p5 = scmp.ge.s32.totalorder %s732_s23, 2 }
   0xb   : > { %p122_p6 = scmp.eq.s32.totalorder %s365_s21, 7  ;;  %p368_p7 = scmp.ge.s32.totalorder %s548_s19, 1 }
   0xc   : > { %p159_p8 = scmp.lt.s32.totalorder %s548_s19, 9  ;;  %s734_s23 = smov (%p30_p5, %s732_s23), 0 }
   0xd   : > { %p630_p9 = por %p122_p6, %p121_p4  ;;  %s102_s26 = ssub.s32 %s544_s18, %s734_s23 }
   0xe   : > { %p160_p10 = pnand %p368_p7, %p159_p8  ;;  %s105_s27 = sadd.s32 1, %s528_s14 }
   0xf   : > { %p103_p11 = scmp.eq.s32.totalorder %s102_s26, 0  ;;  %s184_s29 = sand.u32 (!%p160_p10), 1, %s524_s13  }
  0x10   : > { %163 = sbr.rel (%p160_p10) target bundleno = 234 (0xea), region = 32  ;;  %s369_s30 = sshll.u32 (!%p160_p10), %s532_s15, 3 }
  0x11   : > { %s638_s28 = scalar_select %p103_p11, %s528_s14, %s105_s27  }
  0x12   : > { %p187_p12 = scmp.lt.s32.totalorder (!%p160_p10), %s536_s16, 1  ;;  %p189_p13 = scmp.lt.s32.totalorder (!%p160_p10), %s369_s30, 31 }
  0x13   : > { %s649_s11 = scalar_lea.vmem (!%p160_p10), [#allocation3], %s184_s29  ;;  %p372_p0 = scmp.ne.s32.totalorder (!%p160_p10), %s532_s15, 0 }
  0x15   : > { %s188_s4 = scalar_select %p187_p12, %s536_s16, 1 }
  0x16   : > { %s736_s30 = smov (!%p189_p13, %s369_s30), 31  ;;  %199 = sbr.rel (%p372_p0) target bundleno = 29 (0x1d), region = 36 }
  0x17   : > { %s370_s5 = sshll.u32 %s188_s4, 5 }
  0x18   : > { %s192_s6 = sadd.s32 %s370_s5, %s736_s30 }
  0x19   : > { %s371_s7 = sshll.u32 %s192_s6, 3 }
  0x1a   : > { %s194_s10 = scalar_lea.vmem %s716_s0, %s371_s7 }
  0x1b   : > { %vm200_vm0 = vcmask 24576   ;;  %v550_v0 = vmov 0.0  }
  0x1c   : > { %201 = vst.msk [vmem:[#allocation2] sm:$0x1] %vm200_vm0, %v550_v0 }
  0x1d PF: > { %v203_v1 = vld [vmem:[%s194_s10] sm:$0xff]  ;;  %v204_v2 = vld [vmem:[%s194_s10 + $0x8] sm:$0xff]  ;;  %vm211_vm1 = vcmask 31744   ;;  %v205_v3 = vld [vmem:[%s194_s10 + $0x10] sm:$0xff]  ;;  %vm234_vm2 = vcmask 24576   ;;  %p373_p1 = scmp.ne.s32.totalorder %s532_s15, 3 }
  0x1e   : > { %v206_v4 = vld [vmem:[%s194_s10 + $0x18] sm:$0xff]  ;;  %v212_v5 = vsel %vm211_vm1, %v203_v1, 0.0  ;;  %v213_v6 = vsel %vm211_vm1, %v204_v2, 0.0  ;;  %v207_v7 = vld [vmem:[%s194_s10 + $0x20] sm:$0xff]  ;;  %v215_v9 = vsel %vm211_vm1, %v205_v3, 0.0  ;;  %v208_v11 = vld [vmem:[%s194_s10 + $0x28] sm:$0xff] }
  0x1f   : > { %v214_v8 = vadd.f32 %v213_v6, %v212_v5  ;;  %v217_v10 = vsel %vm211_vm1, %v206_v4, 0.0  ;;  %v219_v13 = vsel %vm211_vm1, %v207_v7, 0.0  ;;  %v209_v14 = vld [vmem:[%s194_s10 + $0x30] sm:$0xff]  ;;  %v221_v16 = vsel %vm211_vm1, %v208_v11, 0.0  ;;  %v210_v17 = vld [vmem:[%s194_s10 + $0x38] sm:$0xff] }
  0x20   : > { %v223_v19 = vsel %vm211_vm1, %v209_v14, 0.0  ;;  %v225_v21 = vsel %vm211_vm1, %v210_v17, 0.0 }
  0x21   : > { %v216_v12 = vadd.f32 %v215_v9, %v214_v8 }
  0x23   : > { %v218_v15 = vadd.f32 %v217_v10, %v216_v12  ;;  %v202_v29 = vld [vmem:[#allocation2] sm:$0x1] }
  0x25   : > { %v220_v18 = vadd.f32 %v219_v13, %v218_v15 }
  0x27   : > { %v222_v20 = vadd.f32 %v221_v16, %v220_v18 }
  0x29   : > { %v224_v22 = vadd.f32 %v223_v19, %v222_v20 }
  0x2b   : > { %v226_v23 = vadd.f32 %v225_v21, %v224_v22 }
  0x2d   : > { %v227_v24 = vrot.slane %v226_v23, 4 }
  0x2f   : > { %v228_v25 = vadd.f32 %v227_v24, %v226_v23 }
  0x31   : > { %v229_v26 = vrot.slane %v228_v25, 2 }
  0x33   : > { %v230_v27 = vadd.f32 %v229_v26, %v228_v25 }
  0x35   : > { %v231_v28 = vrot.slane %v230_v27, 1 }
  0x37   : > { %v232_v30 = vadd.f32 %v231_v28, %v230_v27  ;;  %239 = sbr.rel (%p373_p1) target bundleno = 220 (0xdc), region = 40 }
  0x39   : > { %v233_v31 = vadd.f32 %v232_v30, %v202_v29 }
  0x3b   : > { %235 = vst.msk [vmem:[#allocation2] sm:$0x1] %vm234_vm2, %v233_v31 }
  0x3c   : > { %v244_v32 = vld [vmem:[%s717_s1] sm:$0xf]  ;;  %vm247_vm3 = vcmask 1043456  }
  0x3d   : > { %374 = vmatpush.msk.msra.mxu0 %vm247_vm3, %v244_v32  ;;  %v271_v36 = vld [vmem:[%s718_s2] sm:$0x1] }
  0x42   : > { %v240_v33 = vld [vmem:[#allocation2] sm:$0x1] }
  0x43   : > { %v241_v34 = vmul.f32 0.00390625, %v240_v33 }
  0x45   : > { %v243_v35 = vperm.slane %v241_v34, 0 }
  0x47   : > { %375 = vmatmul.msk.f32.vlgmr.msra.gmra.mxu0 %vm211_vm1, %v243_v35 }
  0xc4   : > { %v268_v37 = vpop.f32.mrf.mxu0 }
  0xc5   : > { %v272_v38 = vadd.f32 %v271_v36, %v268_v37 }
  0xc7   : > { %v273_v39 = vsub.f32 0.0, %v272_v38 }
  0xc9   : > { %v274_v40 = vmul.f32 1.442695, %v273_v39 }
  0xcb   : > { %450 = vpow2.f32 %v274_v40 }
  0xd1   : > { %v451_v41 = vpop.eup %450 }
  0xd2   : > { %v276_v42 = vadd.f32 1.0, %v451_v41 }
  0xd4   : > { %452 = vrcp.f32 %v276_v42 }
  0xda   : > { %v453_v43 = vpop.eup %452 }
  0xdb   : > { %278 = vst.msk [vmem:[%s649_s11] sm:$0x1] %vm234_vm2, %v453_v43 }
  0xdc PF: > { %s288_s4 = scalar_lea.hbm %s719_s3, %s536_s16  ;;  %s290_s5 = sshll.u32 %s649_s11, 4  ;;  %s291_s5 = int_to_ptr.vmem [resolvable:$true] %s290_s5 }
  0xdd   : > { %s292_s6 = sshll.u32 %s288_s4, 4  ;;  %s280_s7 = scalar_lea.sflag [#allocation4], %s184_s29  ;;  %s293_s6 = int_to_ptr.hbm [resolvable:$true] %s292_s6 }
  0xde   : > { %s468_s8 = sshra.s32 %s293_s6, 4  ;;  %s474_s21 = scalar_lea.hbm %s719_s3, 2  ;;  %s469_s8 = int_to_ptr.hbm [resolvable:$true] %s468_s8 }
  0xdf   : > { %s470_s9 = scalar_lea.hbm %s469_s8, 1  ;;  %p475_p6 = scmp.lt.s32.totalorder %s469_s8, %s719_s3 }
  0xe0   : > { %p471_p2 = scmp.ne.s32.totalorder %s469_s8, %s470_s9  ;;  %p476_p7 = scmp.lt.s32.totalorder %s474_s21, %s470_s9 }
  0xe2   : > { %p472_p4 = pnand %p471_p2, %p620_p3  ;;  %p477_p8 = por %p476_p7, %p475_p6 }
  0xe4   : > { %p473_p5 = pneg %p472_p4 }
  0xe6   : > { %p478_p10 = pnand %p477_p8, %p473_p5 }
  0xe8   : > { %481 = shalt.err (!%p478_p10)
}
  0xe9   : > { %378 = dma.vmem_to_hbm [thread:$0]  (%p620_p3), %s291_s5, 16, %s293_s6, %s280_s7  }
  0xea PF: > { %p384_p11 = scmp.ge.s32.totalorder %s548_s19, 2  ;;  %s304_s16 = sand.u32 1, %s520_s12  }
  0xeb   : > { %s305_s29 = scalar_lea.sflag [#allocation4], %s304_s16 }
  0xec   : > { %p381_p12 = pnand %p384_p11, %p630_p9 }
  0xee   : > { %p382_p13 = pneg %p381_p12 }
  0xf0   : > { %515 = dma.done.wait (%p382_p13), %s305_s29, 16  }
  0xf1   : > { %517 = vsyncadd (%p382_p13), %s305_s29, 4294967280  ;;  %s16_s19 = sadd.s32 1, %s548_s19   ;;  %s722_s12 = smov %s524_s13 }
  0xf2   : > { %p13_p0 = scmp.ge.s32.totalorder %s16_s19, 10   ;;  %s723_s13 = smov %s528_s14 }
  0xf3   : > { %s724_s14 = smov %s638_s28  ;;  %s725_s15 = smov %s540_s17 }
  0xf4   : > { %s726_s16 = smov %s544_s18  ;;  %s727_s17 = smov %s730_s22 }
  0xf5   : > { %s728_s18 = smov %s734_s23  ;;  %15 = sbr.rel (!%p13_p0) target bundleno = 5 (0x5), region = 75 }
  0xfa   :  { %310 = vsyncpa [#allocation4], 1 }
  0xfb   :  { %312 = vsyncpa [#allocation4 + $0x1], 1 }

</bundles_post_ra>
